<compile_context>
chip_gen: v7x
topology: tpu7x:2x2x1
jax: 0.10.0
libtpu: 0.0.40
codegen_flags: <defaults>
</compile_context>

<pallas_src>
import math

import jax
import jax.numpy as jnp
import numpy as np
from jax.experimental import pallas as pl
from jax.experimental.pallas import tpu as pltpu


# ----------------------------------------------------------------------------
# Fused kernel: box/corner sparse embeddings + dense no-mask broadcast
#   t       = c_x*gx' + c_y*gy' + g_bias           (all PE constants pre-folded)
#   sparse  = sin(t)@W_sin + cos(t)@W_cos + cls@W_cls + (bias + alt_corner_emb)
#   dense   = broadcast(no_mask_embed) over (B, E, H*W)   (lane-dense)
# ----------------------------------------------------------------------------
def _prompt_kernel(coords_ref, cls_ref, g_ref, w_sin_ref, w_cos_ref, w_cls_ref,
                   alt_ref, no_mask_ref, sparse_ref, dense_ref):
    coords = coords_ref[...]                       # (M, 2) pixel coords, M = B*N
    g = g_ref[...]                                 # (3, E//2): [gx', gy', t_bias]
    # t = 2*pi * ((2*(c + 0.5)/img_size - 1) @ gaussian) with every constant
    # folded host-side into g: 2 muls + 2 adds on the VPU.
    t = coords[:, 0:1] * g[0:1, :] + coords[:, 1:2] * g[1:2, :] + g[2:3, :]

    out = jnp.dot(jnp.sin(t), w_sin_ref[...], preferred_element_type=jnp.float32)
    out = out + jnp.dot(jnp.cos(t), w_cos_ref[...], preferred_element_type=jnp.float32)
    out = out + jnp.dot(cls_ref[...], w_cls_ref[...], preferred_element_type=jnp.float32)
    # alt already contains the Linear bias + alternating point_embeddings[2]/[3]
    sparse_ref[...] = out + alt_ref[...]

    # dense "no mask" embedding, emitted lane-dense as (B, E, H*W)
    v = no_mask_ref[...]                           # (1, E)
    dense_ref[...] = jnp.broadcast_to(v[:, :, None], dense_ref.shape)


def prompt_encoder_fused(coords_flat, cls_flat, g_packed, w_sin, w_cos, w_cls,
                         alt_bias, no_mask, *, bs, hw):
    M = coords_flat.shape[0]
    Dc = cls_flat.shape[-1]
    Eh, E = w_sin.shape

    return pl.pallas_call(
        _prompt_kernel,
        out_shape=(jax.ShapeDtypeStruct((M, E), jnp.float32),
                   jax.ShapeDtypeStruct((bs, E, hw), jnp.float32)),
        grid_spec=pltpu.PrefetchScalarGridSpec(
            num_scalar_prefetch=0,
            grid=(1,),                              # everything fits VMEM; one step
            in_specs=[
                pl.BlockSpec((M, 2), lambda i: (0, 0)),      # flattened coords
                pl.BlockSpec((M, Dc), lambda i: (0, 0)),     # per-corner class emb
                pl.BlockSpec((3, Eh), lambda i: (0, 0)),     # folded gaussian + bias
                pl.BlockSpec((Eh, E), lambda i: (0, 0)),     # W (sin half)
                pl.BlockSpec((Eh, E), lambda i: (0, 0)),     # W (cos half)
                pl.BlockSpec((Dc, E), lambda i: (0, 0)),     # W (class half)
                pl.BlockSpec((M, E), lambda i: (0, 0)),      # bias + alt corner emb
                pl.BlockSpec((1, E), lambda i: (0, 0)),      # no_mask_embed
            ],
            out_specs=[
                pl.BlockSpec((M, E), lambda i: (0, 0)),
                pl.BlockSpec((bs, E, hw), lambda i: (0, 0, 0)),
            ],
        ),
        compiler_params=pltpu.CompilerParams(dimension_semantics=("arbitrary",)),
    )(coords_flat, cls_flat, g_packed, w_sin, w_cos, w_cls, alt_bias, no_mask)


# ----------------------------------------------------------------------------
# PromptEncoder wrapper (parameter setup + host-side weight folding in plain JAX)
# ----------------------------------------------------------------------------
class PromptEncoderPallas:
    def __init__(self, embed_dim, image_embedding_size, input_image_size,
                 mask_in_chans, clip_dim, key):
        self.embed_dim = embed_dim
        self.image_embedding_size = image_embedding_size
        self.input_image_size = input_image_size
        self.clip_dim = clip_dim
        in_chan = embed_dim + clip_dim     # concat of PE and class embedding
        out_chan = embed_dim

        ks = jax.random.split(key, 8)
        # PositionEmbeddingRandom: scale * randn(2, embed_dim // 2), scale = 1.0
        self.pe_gaussian = jax.random.normal(ks[0], (2, embed_dim // 2), jnp.float32)
        # nn.Embedding(1, embed_dim) x 4, not_a_point, no_mask  (N(0,1) init)
        self.point_embeddings = [
            jax.random.normal(ks[1 + i], (1, embed_dim), jnp.float32) for i in range(4)
        ]
        self.not_a_point_embed = jax.random.normal(ks[5], (1, embed_dim), jnp.float32)
        self.no_mask_embed = jax.random.normal(ks[6], (1, embed_dim), jnp.float32)
        # chan_transform = nn.Linear(in_chan, out_chan): y = x @ W.T + b
        kw, kb = jax.random.split(ks[7])
        bound = 1.0 / math.sqrt(in_chan)
        w = jax.random.uniform(kw, (out_chan, in_chan), jnp.float32, -bound, bound)
        self.chan_b = jax.random.uniform(kb, (1, out_chan), jnp.float32, -bound, bound)
        self.chan_w_full = w.T                    # (in_chan, out_chan)

        # ---- host-side weight prep for the fused kernel (all one-time, free) ----
        # split the Linear weight so no concatenate is needed in-kernel
        self.w_sin = self.chan_w_full[: embed_dim // 2, :]
        self.w_cos = self.chan_w_full[embed_dim // 2: embed_dim, :]
        self.w_cls = self.chan_w_full[embed_dim:, :]
        # fold coordinate normalization (2*(c+0.5)/size - 1) and the 2*pi factor
        # into the gaussian matrix: t = c_x*gx' + c_y*gy' + t_bias
        img_h, img_w = input_image_size
        ax, bx = 2.0 / img_w, 1.0 / img_w - 1.0
        ay, by = 2.0 / img_h, 1.0 / img_h - 1.0
        two_pi = 2.0 * math.pi
        g0, g1 = self.pe_gaussian[0], self.pe_gaussian[1]
        self.g_packed = jnp.stack(
            [two_pi * ax * g0, two_pi * ay * g1, two_pi * (bx * g0 + by * g1)],
            axis=0).astype(jnp.float32)           # (3, E//2)
        # even corner -> point_embeddings[2] + bias, odd corner -> [3] + bias
        self.alt_pair = jnp.concatenate(
            [self.point_embeddings[2] + self.chan_b,
             self.point_embeddings[3] + self.chan_b], axis=0)   # (2, E)

    def forward(self, points, boxes, masks, texts):
        if points is not None:
            bs = points[0].shape[0]
        elif boxes is not None:
            bs = boxes[0].shape[0]
        elif masks is not None:
            bs = masks[0].shape[0]
        else:
            bs = 1
        H, W = self.image_embedding_size
        E = self.embed_dim

        # _embed_texts: stacked BiomedCLIP class embeddings (synthetic pass-through)
        text_embeddings = texts
        if masks is not None:
            raise NotImplementedError("mask_downscaling path not exercised")  # TODO(synk)

        if boxes is not None:
            coords, class_embeddings = boxes
            B, N, _ = coords.shape
            assert N % 2 == 0 and N == 2 * class_embeddings.shape[1]
            M = B * N
            coords_flat = coords.reshape(M, 2).astype(jnp.float32)
            # class_embeddings.repeat_interleave(2, dim=1): one embedding per corner.
            # TODO(synk): at production clip_dim (512/768) duplicate rows in-kernel
            #             instead to halve HBM read traffic; trivial at these sizes.
            cls_flat = jnp.repeat(class_embeddings, 2, axis=1).reshape(M, -1)
            cls_flat = cls_flat.astype(jnp.float32)
            # parity of the flattened row index == within-batch corner parity (N even)
            alt_bias = jnp.tile(self.alt_pair, (M // 2, 1))

            sparse_flat, dense_flat = prompt_encoder_fused(
                coords_flat, cls_flat, self.g_packed, self.w_sin, self.w_cos,
                self.w_cls, alt_bias, self.no_mask_embed, bs=bs, hw=H * W)
            sparse_embeddings = sparse_flat.reshape(B, N, E)
            dense_embeddings = dense_flat.reshape(bs, E, H, W)
        else:
            sparse_embeddings = jnp.zeros((bs, 0, E), jnp.float32)
            # pure broadcast of ~tens of KiB: a pallas_call's launch overhead would
            # exceed the copy, so use plain XLA here.
            dense_embeddings = jnp.broadcast_to(
                self.no_mask_embed.reshape(1, E, 1, 1), (bs, E, H, W))
        return sparse_embeddings, dense_embeddings, text_embeddings


# ----------------------------------------------------------------------------
# Pure-JAX reference (unfolded math) for correctness check
# ----------------------------------------------------------------------------
def _ref_box_embed(enc, coords, class_embeddings):
    c = coords + 0.5
    x = c[..., 0] / enc.input_image_size[1]
    y = c[..., 1] / enc.input_image_size[0]
    cn = jnp.stack([2 * x - 1, 2 * y - 1], axis=-1)
    t = 2 * np.pi * (cn @ enc.pe_gaussian)
    pe = jnp.concatenate([jnp.sin(t), jnp.cos(t)], axis=-1)
    cls_rep = jnp.repeat(class_embeddings, 2, axis=1)
    cat = jnp.concatenate([pe, cls_rep], axis=-1)
    out = cat @ enc.chan_w_full + enc.chan_b
    N = out.shape[1]
    alt = jnp.where((jnp.arange(N) % 2 == 0)[None, :, None],
                    enc.point_embeddings[2][None], enc.point_embeddings[3][None])
    return out + alt


if __name__ == "__main__":
    key = jax.random.PRNGKey(0)
    k_param, k_coords, k_boxcls, k_text = jax.random.split(key, 4)

    embed_dim = 32
    clip_dim = 32
    image_embedding_size = (16, 16)
    input_image_size = (64, 64)
    mask_in_chans = 16
    B, n_boxes, n_text = 2, 4, 3

    enc = PromptEncoderPallas(embed_dim, image_embedding_size, input_image_size,
                              mask_in_chans, clip_dim, k_param)

    # box corner coordinates in pixel space: (B, 2*n_boxes, 2)
    coords = jax.random.uniform(k_coords, (B, 2 * n_boxes, 2), jnp.float32) * 64.0
    # synthetic BiomedCLIP class embeddings per box: (B, n_boxes, clip_dim)
    box_cls = jax.random.normal(k_boxcls, (B, n_boxes, clip_dim), jnp.float32)
    # synthetic text embeddings: (B, n_text, clip_dim)
    text_cls = jax.random.normal(k_text, (B, n_text, clip_dim), jnp.float32)

    sparse, dense, text = enc.forward(points=None, boxes=(coords, box_cls),
                                      masks=None, texts=text_cls)
    jax.block_until_ready((sparse, dense, text))

    # correctness checks against pure-JAX reference
    sparse_ref = _ref_box_embed(enc, coords, box_cls)
    dense_ref = jnp.broadcast_to(enc.no_mask_embed.reshape(1, embed_dim, 1, 1),
                                 (B, embed_dim, *image_embedding_size))
    assert sparse.shape == (B, 2 * n_boxes, embed_dim)
    assert dense.shape == (B, embed_dim, *image_embedding_size)
    assert text.shape == (B, n_text, clip_dim)
    np.testing.assert_allclose(np.asarray(sparse), np.asarray(sparse_ref),
                               rtol=1e-4, atol=1e-4)
    np.testing.assert_allclose(np.asarray(dense), np.asarray(dense_ref),
                               rtol=1e-6, atol=1e-6)

    print("KERNEL_OK")
</pallas_src>

<mosaic_0001>
module attributes {stable_mosaic.version = 11 : i64} {
  func.func @_prompt_kernel(%arg0: i32, %arg1: memref<16x2xf32, #tpu.memory_space<vmem>>, %arg2: memref<16x32xf32, #tpu.memory_space<vmem>>, %arg3: memref<3x16xf32, #tpu.memory_space<vmem>>, %arg4: memref<16x32xf32, #tpu.memory_space<vmem>>, %arg5: memref<16x32xf32, #tpu.memory_space<vmem>>, %arg6: memref<32x32xf32, #tpu.memory_space<vmem>>, %arg7: memref<16x32xf32, #tpu.memory_space<vmem>>, %arg8: memref<1x32xf32, #tpu.memory_space<vmem>>, %arg9: memref<16x32xf32, #tpu.memory_space<vmem>>, %arg10: memref<2x32x256xf32, #tpu.memory_space<vmem>>) attributes {dimension_semantics = [#tpu.dimension_semantics<arbitrary>], iteration_bounds = array<i64: 1>, scalar_prefetch = 0 : i64, scratch_operands = 0 : i64, tpu.core_type = #tpu.core_type<tc>, window_params = [{pipeline_mode = #tpu.pipeline_mode<synchronous>, transform_indices = @transform_0, window_bounds = array<i64: 16, 2>}, {pipeline_mode = #tpu.pipeline_mode<synchronous>, transform_indices = @transform_1, window_bounds = array<i64: 16, 32>}, {pipeline_mode = #tpu.pipeline_mode<synchronous>, transform_indices = @transform_2, window_bounds = array<i64: 3, 16>}, {pipeline_mode = #tpu.pipeline_mode<synchronous>, transform_indices = @transform_3, window_bounds = array<i64: 16, 32>}, {pipeline_mode = #tpu.pipeline_mode<synchronous>, transform_indices = @transform_4, window_bounds = array<i64: 16, 32>}, {pipeline_mode = #tpu.pipeline_mode<synchronous>, transform_indices = @transform_5, window_bounds = array<i64: 32, 32>}, {pipeline_mode = #tpu.pipeline_mode<synchronous>, transform_indices = @transform_6, window_bounds = array<i64: 16, 32>}, {pipeline_mode = #tpu.pipeline_mode<synchronous>, transform_indices = @transform_7, window_bounds = array<i64: 1, 32>}, {pipeline_mode = #tpu.pipeline_mode<synchronous>, transform_indices = @transform_8, window_bounds = array<i64: 16, 32>}, {pipeline_mode = #tpu.pipeline_mode<synchronous>, transform_indices = @transform_9, window_bounds = array<i64: 2, 32, 256>}]} {
    %c0 = arith.constant 0 : index
    %c0_0 = arith.constant 0 : index
    %0 = vector.load %arg1[%c0, %c0_0] : memref<16x2xf32, #tpu.memory_space<vmem>>, vector<16x2xf32>
    %c0_1 = arith.constant 0 : index
    %c0_2 = arith.constant 0 : index
    %1 = vector.load %arg3[%c0_1, %c0_2] : memref<3x16xf32, #tpu.memory_space<vmem>>, vector<3x16xf32>
    %2 = vector.extract_strided_slice %0 {offsets = [0, 0], sizes = [16, 1], strides = [1, 1]} : vector<16x2xf32> to vector<16x1xf32>
    %3 = vector.extract_strided_slice %1 {offsets = [0, 0], sizes = [1, 16], strides = [1, 1]} : vector<3x16xf32> to vector<1x16xf32>
    %4 = vector.broadcast %2 : vector<16x1xf32> to vector<16x16xf32>
    %5 = vector.broadcast %3 : vector<1x16xf32> to vector<16x16xf32>
    %6 = arith.mulf %4, %5 : vector<16x16xf32>
    %7 = vector.extract_strided_slice %0 {offsets = [0, 1], sizes = [16, 1], strides = [1, 1]} : vector<16x2xf32> to vector<16x1xf32>
    %8 = vector.extract_strided_slice %1 {offsets = [1, 0], sizes = [1, 16], strides = [1, 1]} : vector<3x16xf32> to vector<1x16xf32>
    %9 = vector.broadcast %7 : vector<16x1xf32> to vector<16x16xf32>
    %10 = vector.broadcast %8 : vector<1x16xf32> to vector<16x16xf32>
    %11 = arith.mulf %9, %10 : vector<16x16xf32>
    %12 = arith.addf %6, %11 : vector<16x16xf32>
    %13 = vector.extract_strided_slice %1 {offsets = [2, 0], sizes = [1, 16], strides = [1, 1]} : vector<3x16xf32> to vector<1x16xf32>
    %14 = vector.broadcast %13 : vector<1x16xf32> to vector<16x16xf32>
    %15 = arith.addf %12, %14 : vector<16x16xf32>
    %16 = math.sin %15 : vector<16x16xf32>
    %c0_3 = arith.constant 0 : index
    %c0_4 = arith.constant 0 : index
    %17 = vector.load %arg4[%c0_3, %c0_4] : memref<16x32xf32, #tpu.memory_space<vmem>>, vector<16x32xf32>
    %cst = arith.constant dense<0.000000e+00> : vector<16x32xf32>
    %18 = tpu.matmul %16, %17, %cst {dimension_numbers = #tpu.dot_dimension_numbers<[1], [0], [0], [1], [0, 0, 1, 1], [], []>} : vector<16x16xf32>, vector<16x32xf32>, vector<16x32xf32> -> vector<16x32xf32>
    %19 = math.cos %15 : vector<16x16xf32>
    %c0_5 = arith.constant 0 : index
    %c0_6 = arith.constant 0 : index
    %20 = vector.load %arg5[%c0_5, %c0_6] : memref<16x32xf32, #tpu.memory_space<vmem>>, vector<16x32xf32>
    %cst_7 = arith.constant dense<0.000000e+00> : vector<16x32xf32>
    %21 = tpu.matmul %19, %20, %cst_7 {dimension_numbers = #tpu.dot_dimension_numbers<[1], [0], [0], [1], [0, 0, 1, 1], [], []>} : vector<16x16xf32>, vector<16x32xf32>, vector<16x32xf32> -> vector<16x32xf32>
    %22 = arith.addf %18, %21 : vector<16x32xf32>
    %c0_8 = arith.constant 0 : index
    %c0_9 = arith.constant 0 : index
    %23 = vector.load %arg2[%c0_8, %c0_9] : memref<16x32xf32, #tpu.memory_space<vmem>>, vector<16x32xf32>
    %c0_10 = arith.constant 0 : index
    %c0_11 = arith.constant 0 : index
    %24 = vector.load %arg6[%c0_10, %c0_11] : memref<32x32xf32, #tpu.memory_space<vmem>>, vector<32x32xf32>
    %cst_12 = arith.constant dense<0.000000e+00> : vector<16x32xf32>
    %25 = tpu.matmul %23, %24, %cst_12 {dimension_numbers = #tpu.dot_dimension_numbers<[1], [0], [0], [1], [0, 0, 1, 1], [], []>} : vector<16x32xf32>, vector<32x32xf32>, vector<16x32xf32> -> vector<16x32xf32>
    %26 = arith.addf %22, %25 : vector<16x32xf32>
    %c0_13 = arith.constant 0 : index
    %c0_14 = arith.constant 0 : index
    %27 = vector.load %arg7[%c0_13, %c0_14] : memref<16x32xf32, #tpu.memory_space<vmem>>, vector<16x32xf32>
    %28 = arith.addf %26, %27 : vector<16x32xf32>
    %c0_15 = arith.constant 0 : index
    %c0_16 = arith.constant 0 : index
    %29 = vector.load %arg9[%c0_15, %c0_16] : memref<16x32xf32, #tpu.memory_space<vmem>>, vector<16x32xf32>
    tpu.vector_store %arg9[%c0_15, %c0_16], %28 {strides = array<i32>} : memref<16x32xf32, #tpu.memory_space<vmem>>, vector<16x32xf32>,
    %c0_17 = arith.constant 0 : index
    %c0_18 = arith.constant 0 : index
    %30 = vector.load %arg8[%c0_17, %c0_18] : memref<1x32xf32, #tpu.memory_space<vmem>>, vector<1x32xf32>
    %31 = vector.shape_cast %30 : vector<1x32xf32> to vector<1x32x1xf32>
    %32 = vector.shape_cast %31 : vector<1x32x1xf32> to vector<1x32x1xf32>
    %33 = vector.broadcast %32 : vector<1x32x1xf32> to vector<2x32x256xf32>
    %c0_19 = arith.constant 0 : index
    %c0_20 = arith.constant 0 : index
    %c0_21 = arith.constant 0 : index
    %34 = vector.load %arg10[%c0_19, %c0_20, %c0_21] : memref<2x32x256xf32, #tpu.memory_space<vmem>>, vector<2x32x256xf32>
    tpu.vector_store %arg10[%c0_19, %c0_20, %c0_21], %33 {strides = array<i32>} : memref<2x32x256xf32, #tpu.memory_space<vmem>>, vector<2x32x256xf32>,
    return
  }
  func.func @transform_0(%arg0: i32) -> (i32, i32) {
    %c0_i32 = arith.constant 0 : i32
    %c0_i32_0 = arith.constant 0 : i32
    %c0_i32_1 = arith.constant 0 : i32
    return %c0_i32, %c0_i32_0 : i32, i32
  }
  func.func @transform_1(%arg0: i32) -> (i32, i32) {
    %c0_i32 = arith.constant 0 : i32
    %c0_i32_0 = arith.constant 0 : i32
    %c0_i32_1 = arith.constant 0 : i32
    return %c0_i32, %c0_i32_0 : i32, i32
  }
  func.func @transform_2(%arg0: i32) -> (i32, i32) {
    %c0_i32 = arith.constant 0 : i32
    %c0_i32_0 = arith.constant 0 : i32
    %c0_i32_1 = arith.constant 0 : i32
    return %c0_i32, %c0_i32_0 : i32, i32
  }
  func.func @transform_3(%arg0: i32) -> (i32, i32) {
    %c0_i32 = arith.constant 0 : i32
    %c0_i32_0 = arith.constant 0 : i32
    %c0_i32_1 = arith.constant 0 : i32
    return %c0_i32, %c0_i32_0 : i32, i32
  }
  func.func @transform_4(%arg0: i32) -> (i32, i32) {
    %c0_i32 = arith.constant 0 : i32
    %c0_i32_0 = arith.constant 0 : i32
    %c0_i32_1 = arith.constant 0 : i32
    return %c0_i32, %c0_i32_0 : i32, i32
  }
  func.func @transform_5(%arg0: i32) -> (i32, i32) {
    %c0_i32 = arith.constant 0 : i32
    %c0_i32_0 = arith.constant 0 : i32
    %c0_i32_1 = arith.constant 0 : i32
    return %c0_i32, %c0_i32_0 : i32, i32
  }
  func.func @transform_6(%arg0: i32) -> (i32, i32) {
    %c0_i32 = arith.constant 0 : i32
    %c0_i32_0 = arith.constant 0 : i32
    %c0_i32_1 = arith.constant 0 : i32
    return %c0_i32, %c0_i32_0 : i32, i32
  }
  func.func @transform_7(%arg0: i32) -> (i32, i32) {
    %c0_i32 = arith.constant 0 : i32
    %c0_i32_0 = arith.constant 0 : i32
    %c0_i32_1 = arith.constant 0 : i32
    return %c0_i32, %c0_i32_0 : i32, i32
  }
  func.func @transform_8(%arg0: i32) -> (i32, i32) {
    %c0_i32 = arith.constant 0 : i32
    %c0_i32_0 = arith.constant 0 : i32
    %c0_i32_1 = arith.constant 0 : i32
    return %c0_i32, %c0_i32_0 : i32, i32
  }
  func.func @transform_9(%arg0: i32) -> (i32, i32, i32) {
    %c0_i32 = arith.constant 0 : i32
    %c0_i32_0 = arith.constant 0 : i32
    %c0_i32_1 = arith.constant 0 : i32
    %c0_i32_2 = arith.constant 0 : i32
    return %c0_i32, %c0_i32_0, %c0_i32_1 : i32, i32, i32
  }
}

</mosaic_0001>

<bundles_post_ra>
// kernel: tpu_custom_call.1
= control target key start
LH: loop header
LB: loop body
LE: loop exit
PB: predicated region body
PF: predicated region fallthrough
CT: control target
= control target key end

     0   :  { %15 = vsyncpa [#allocation3], 0  ;;  %s1426_s0 = inlined_call_operand.vmem [shape: f32[16,2], index: 0, kind: input, shape index: {}]   ;;  %s1427_s1 = inlined_call_operand.hbm [shape: f32[16,32], index: 1, kind: input, shape index: {}]   ;;  %s1428_s2 = inlined_call_operand.vmem [shape: f32[3,16], index: 2, kind: input, shape index: {}]   ;;  %s1429_s3 = inlined_call_operand.hbm [shape: f32[16,32], index: 3, kind: input, shape index: {}]   ;;  %s1430_s4 = inlined_call_operand.hbm [shape: f32[16,32], index: 4, kind: input, shape index: {}]   ;;  %s1431_s5 = inlined_call_operand.vmem [shape: f32[32,32], index: 5, kind: input, shape index: {}]   ;;  %s1432_s6 = inlined_call_operand.hbm [shape: f32[16,32], index: 6, kind: input, shape index: {}]   ;;  %s1433_s7 = inlined_call_operand.vmem [shape: f32[1,32], index: 7, kind: input, shape index: {}]   ;;  %s1434_s8 = inlined_call_operand.hbm [shape: f32[16,32], index: 8, kind: output, shape index: {0}]   ;;  %s1435_s9 = inlined_call_operand.hbm [shape: f32[2,32,256], index: 9, kind: output, shape index: {1}]  }
   0x1   :  { %16 = vsyncpa [#allocation6], 0 }
   0x2   :  { %17 = vsyncpa [#allocation9], 0 }
   0x3   :  { %18 = vsyncpa [#allocation4], 0 }
   0x4   :  { %19 = vsyncpa [#allocation12], 0  ;;  %s1139_s30 = smov [#allocation5]   ;;  %s1140_s11 = smov [#allocation2]  }
   0x5   :  { %s41_s10 = sshll.u32 %s1139_s30, 4  ;;  %s27_s12 = sshll.u32 %s1140_s11, 4  ;;  %s42_s10 = int_to_ptr.vmem [resolvable:$true] %s41_s10  ;;  %s1207_s12 = int_to_ptr.vmem [resolvable:$true] %s27_s12 }
   0x6   :  { %s997_s15 = scalar_lea.hbm %s1429_s3, 256 }
   0x7   :  { %p998_p0 = scmp.ne.s32.totalorder %s1429_s3, %s997_s15  ;;  %p1001_p1 = scmp.lt.u32.totalorder %s997_s15, %s1429_s3 }
   0x9   :  { %p1003_p2 = pnand %p1001_p1, %p998_p0 }
   0xb   :  { %1006 = shalt.err (!%p1003_p2)
}
   0xc   :  { %s1007_s20 = scalar_lea.vmem %s42_s10, 256  ;;  %p1012_p4 = scmp.lt.s32.totalorder %s42_s10, %s42_s10 }
   0xd   :  { %p1008_p3 = scmp.ne.s32.totalorder %s42_s10, %s1007_s20  ;;  %p1013_p5 = scmp.lt.s32.totalorder %s1007_s20, %s1007_s20 }
   0xf   :  { %p1014_p6 = por %p1013_p5, %p1012_p4 }
  0x11   :  { %p1015_p7 = pnand %p1014_p6, %p1008_p3 }
  0x13   :  { %1018 = shalt.err (!%p1015_p7)
}
  0x14   :  { %s1141_s21 = smov 128   ;;  %s1142_s22 = smov 8  }
  0x15   :  { %47 = dma.hbm_to_vmem [thread:$0]  %s1429_s3, 256, %s42_s10, [#allocation6], %s1141_s21, %s1141_s21, %s1142_s22  }
  0x16   :  { %s1019_s27 = scalar_lea.hbm %s1427_s1, 256 }
  0x17   :  { %p1020_p8 = scmp.ne.s32.totalorder %s1427_s1, %s1019_s27  ;;  %p1023_p9 = scmp.lt.u32.totalorder %s1019_s27, %s1427_s1 }
  0x19   :  { %p1025_p10 = pnand %p1023_p9, %p1020_p8 }
  0x1b   :  { %1028 = shalt.err (!%p1025_p10)
}
  0x1c   :  { %s1029_s13 = scalar_lea.vmem %s1207_s12, 256  ;;  %p1034_p12 = scmp.lt.s32.totalorder %s1207_s12, %s1207_s12 }
  0x1d   :  { %p1030_p11 = scmp.ne.s32.totalorder %s1207_s12, %s1029_s13  ;;  %p1035_p13 = scmp.lt.s32.totalorder %s1029_s13, %s1029_s13 }
  0x1f   :  { %p1036_p0 = por %p1035_p13, %p1034_p12 }
  0x21   :  { %p1037_p1 = pnand %p1036_p0, %p1030_p11 }
  0x23   :  { %1040 = shalt.err (!%p1037_p1)
}
  0x24   :  { %33 = dma.hbm_to_vmem [thread:$0]  %s1427_s1, 256, %s1207_s12, [#allocation3], %s1141_s21, %s1141_s21, %s1142_s22  }
  0x25   :  { %s1143_s14 = smov [#allocation7]   ;;  %s1144_s16 = smov [#allocation8]  }
  0x26   :  { %s53_s15 = sshll.u32 %s1143_s14, 4  ;;  %s67_s17 = sshll.u32 %s1144_s16, 4  ;;  %s54_s15 = int_to_ptr.vmem [resolvable:$true] %s53_s15  ;;  %s1244_s17 = int_to_ptr.vmem [resolvable:$true] %s67_s17 }
  0x27   :  { %s1041_s20 = scalar_lea.hbm %s1430_s4, 256 }
  0x28   :  { %p1042_p2 = scmp.ne.s32.totalorder %s1430_s4, %s1041_s20  ;;  %p1045_p3 = scmp.lt.u32.totalorder %s1041_s20, %s1430_s4 }
  0x2a   :  { %p1047_p4 = pnand %p1045_p3, %p1042_p2 }
  0x2c   :  { %1050 = shalt.err (!%p1047_p4)
}
  0x2d   :  { %s1051_s1 = scalar_lea.vmem %s54_s15, 256  ;;  %p1056_p6 = scmp.lt.s32.totalorder %s54_s15, %s54_s15 }
  0x2e   :  { %p1052_p5 = scmp.ne.s32.totalorder %s54_s15, %s1051_s1  ;;  %p1057_p7 = scmp.lt.s32.totalorder %s1051_s1, %s1051_s1 }
  0x30   :  { %p1058_p8 = por %p1057_p7, %p1056_p6 }
  0x32   :  { %p1059_p9 = pnand %p1058_p8, %p1052_p5 }
  0x34   :  { %1062 = shalt.err (!%p1059_p9)
}
  0x35   :  { %59 = dma.hbm_to_vmem [thread:$0]  %s1430_s4, 256, %s54_s15, [#allocation6], %s1141_s21, %s1141_s21, %s1142_s22  }
  0x36   :  { %s1063_s30 = scalar_lea.hbm %s1432_s6, 256 }
  0x37   :  { %p1064_p10 = scmp.ne.s32.totalorder %s1432_s6, %s1063_s30  ;;  %p1067_p11 = scmp.lt.u32.totalorder %s1063_s30, %s1432_s6 }
  0x39   :  { %p1069_p12 = pnand %p1067_p11, %p1064_p10 }
  0x3b   :  { %1072 = shalt.err (!%p1069_p12)
}
  0x3c   :  { %s1073_s14 = scalar_lea.vmem %s1244_s17, 256  ;;  %p1078_p0 = scmp.lt.s32.totalorder %s1244_s17, %s1244_s17 }
  0x3d   :  { %p1074_p13 = scmp.ne.s32.totalorder %s1244_s17, %s1073_s14  ;;  %p1079_p1 = scmp.lt.s32.totalorder %s1073_s14, %s1073_s14 }
  0x3f   :  { %p1080_p2 = por %p1079_p1, %p1078_p0 }
  0x41   :  { %p1081_p3 = pnand %p1080_p2, %p1074_p13 }
  0x43   :  { %1084 = shalt.err (!%p1081_p3)
}
  0x44   :  { %73 = dma.hbm_to_vmem [thread:$0]  %s1432_s6, 256, %s1244_s17, [#allocation9], %s1141_s21, %s1141_s21, %s1142_s22  }
  0x45   :  { %1129 = dma.done.wait [#allocation3], 256  }
  0x46   :  { %1130 = vsyncadd [#allocation3], 4294967040 }
  0x47   :  { %1131 = dma.done.wait [#allocation6], 512  }
  0x48   :  { %1132 = vsyncadd [#allocation6], 4294966784 }
  0x49   :  { %1133 = dma.done.wait [#allocation9], 256  }
  0x4a   :  { %1134 = vsyncadd [#allocation9], 4294967040  ;;  %v1145_v0 = vmov 0   ;;  %v89_v1 = vld [vmem:[%s1426_s0 + $0x8] sm:$0xff]  ;;  %v88_v2 = vld [vmem:[%s1426_s0] sm:$0xff]  ;;  %v1146_v3 = vmov 1   ;;  %v101_v19 = vlaneseq }
  0x4b   :  { %987 = vset.pattern.permute.xlu1 %v1145_v0  ;;  %985 = vset.pattern.permute.xlu0 %v1145_v0  ;;  %v545_v4 = vld [vmem:[#allocation7] sm:$0xff]  ;;  %v546_v5 = vld [vmem:[#allocation7 + $0x8] sm:$0xff]  ;;  %v337_v7 = vld [vmem:[#allocation5] sm:$0xff]  ;;  %vm716_vm0 = vcmask 261120   ;;  %v1147_v63 = vmov 2102212464  }
  0x4c   :  { %98 = vperm.xlu1 %987, %v89_v1   ;;  %93 = vperm.xlu0 %985, %v88_v2   ;;  %v939_v6 = vpack.c.bf16 %v546_v5, %v545_v4  ;;  %v338_v8 = vld [vmem:[#allocation5 + $0x8] sm:$0xff]  ;;  %v712_v9 = vld [vmem:[%s1431_s5] sm:$0xff]  ;;  %v713_v11 = vld [vmem:[%s1431_s5 + $0x8] sm:$0xff]  ;;  %v102_v20 = vshrl.u32 %v101_v19, 7  ;;  %v1149_v4 = vmov 683565275  }
  0x4d   :  { %v1290_v10 = vpack.c.bf16 %v338_v8, %v337_v7  ;;  %v947_v12 = vpack.c.bf16 %v713_v11, %v712_v9  ;;  %v714_v13 = vld [vmem:[%s1431_s5 + $0x10] sm:$0xff]  ;;  %v715_v14 = vld [vmem:[%s1431_s5 + $0x18] sm:$0xff]  ;;  %v710_v15 = vld [vmem:[#allocation2] sm:$0xff]  ;;  %v1150_v7 = vmov 1326507024  }
  0x4e   :  { %940 = vmatprep.subr.bf16.mxu0 %v939_v6  ;;  %v951_v16 = vpack.c.bf16 %v715_v14, %v714_v13  ;;  %936 = vmatprep.mubr.msk.f32.mxu1 %vm716_vm0, %v710_v15  ;;  %v711_v17 = vld [vmem:[#allocation2 + $0x8] sm:$0xff]  ;;  %v899_v18 = vld [vmem:[%s1433_s7] ss:$0 sm:$0xff]  ;;  %v103_v21 = vsub.s32 0, %v102_v20  ;;  %v117_v22 = vsub.s32 1, %v102_v20  ;;  %v125_v26 = vsub.s32 2, %v102_v20 }
  0x4f   :  { %942 = vmatpush3.bf16.msra.mxu0 %v939_v6  ;;  %948 = vmatprep.subr.bf16.mxu1 %v947_v12  ;;  %v90_v23 = vld [vmem:[%s1428_s2] sm:$0x7]  ;;  %v1151_v9 = vmov 2475754826   ;;  %s1153_s2 = smov [#allocation11]  }
  0x50   :  { %988 = vset.pattern.permute.xlu1 %v1146_v3  ;;  %986 = vset.pattern.permute.xlu0 %v1146_v3  ;;  %v104_v27 = vrot.slane %v90_v23, %v103_v21  ;;  %v118_v28 = vrot.slane %v90_v23, %v117_v22  ;;  %v126_v29 = vrot.slane %v90_v23, %v125_v26  ;;  %s859_s7 = sshll.u32 %s1153_s2, 4  ;;  %s860_s7 = int_to_ptr.vmem [resolvable:$true] %s859_s7 }
  0x51   :  { %112 = vperm.xlu1 %988, %v89_v1   ;;  %108 = vperm.xlu0 %986, %v88_v2   ;;  %v1148_v1 = vmov 920167782   ;;  %s1085_s29 = scalar_lea.vmem %s860_s7, 2048  ;;  %p1090_p5 = scmp.lt.s32.totalorder %s860_s7, %s860_s7 }
  0x52   :  { %944 = vmatprep.subr.bf16.mxu0 %v1290_v10  ;;  %950 = vmatpush3.bf16.msra.mxu1 %v947_v12  ;;  %v1152_v12 = vmov 2131351028   ;;  %p1086_p4 = scmp.ne.s32.totalorder %s860_s7, %s1085_s29  ;;  %p1091_p6 = scmp.lt.s32.totalorder %s1085_s29, %s1085_s29 }
  0x53   :  { %952 = vmatprep.subr.bf16.mxu1 %v951_v16 }
  0x54   :  { %p1092_p7 = por %p1091_p6, %p1090_p5 }
  0x55   :  { %812 = vbcast.lane.b32.xlu1 %v899_v18, 256  ;;  %816 = vbcast.lane.b32.xlu0 %v899_v18, 264 }
  0x56   :  { %954 = vmatpush3.bf16.msra.mxu1 %v951_v16  ;;  %p1093_p8 = pnand %p1092_p7, %p1086_p4 }
  0x59   :  { %937 = vmatmul.mubr.msk.f32.vlgmr.msra.gmra.mrb[0].mxu1 %vm716_vm0, %v711_v17  ;;  %820 = vbcast.lane.b32.xlu1 %v899_v18, 272 }
  0x5a   :  { %824 = vbcast.lane.b32.xlu0 %v899_v18, 280 }
  0xcb   :  { %v94_v24 = vpop.permute.xlu0 %93  ;;  %v99_v25 = vpop.permute.xlu1 %98 }
  0xcc   :  { %v105_v32 = vmul.f32 %v104_v27, %v94_v24  ;;  %v106_v33 = vmul.f32 %v104_v27, %v99_v25 }
  0xd0   :  { %v113_v30 = vpop.permute.xlu1 %112  ;;  %v109_v31 = vpop.permute.xlu0 %108 }
  0xd1   :  { %v120_v34 = vmul.f32 %v118_v28, %v113_v30  ;;  %v119_v35 = vmul.f32 %v118_v28, %v109_v31 }
  0xd3   :  { %v122_v36 = vadd.f32 %v120_v34, %v106_v33  ;;  %v121_v37 = vadd.f32 %v119_v35, %v105_v32 }
  0xd5   :  { %v1310_v38 = vadd.f32 %v126_v29, %v122_v36  ;;  %v1312_v39 = vadd.f32 %v126_v29, %v121_v37 }
  0xd7   :  { %v236_v40 = vand.u32 2139095040, %v1310_v38  ;;  %v132_v41 = vand.u32 2139095040, %v1312_v39  ;;  %v129_v42 = vand.u32 2147483647, %v1312_v39  ;;  %v233_v43 = vand.u32 2147483647, %v1310_v38 }
  0xd8   :  { %vm131_vm15 = vcmp.lt.s32.totalorder %v1312_v39, 0 }
  0xd9   :  { %v237_v44 = vshrl.u32 %v236_v40, 23  ;;  %v133_v45 = vshrl.u32 %v132_v41, 23  ;;  %v136_v46 = vand.u32 8388607, %v129_v42  ;;  %v240_v49 = vand.u32 8388607, %v233_v43 }
  0xdb   :  { %v881_v47 = vadd.s32 4294967169, %v237_v44  ;;  %v877_v48 = vadd.s32 4294967169, %v133_v45  ;;  %v137_v52 = vor.u32 8388608, %v136_v46  ;;  %v241_v53 = vor.u32 8388608, %v240_v49 }
  0xdd   :  { %v243_v50 = vadd.s32 1, %v881_v47  ;;  %v139_v51 = vadd.s32 1, %v877_v48  ;;  %v1322_v58 = vshll.u32 %v137_v52, 8  ;;  %v1326_v62 = vshll.u32 %v241_v53, 8 }
  0xdf   :  { %vm244_vm1 = vcmp.gt.s32.totalorder %v243_v50, 0  ;;  %vm140_vm2 = vcmp.gt.s32.totalorder %v139_v51, 0 }
  0xe0   :  { %v245_v54 = vsel %vm244_vm1, %v243_v50, 0  ;;  %v141_v55 = vsel %vm140_vm2, %v139_v51, 0  ;;  %vm130_vm1 = vcmp.le.f32.partialorder %v129_v42, 0.7853982  ;;  %vm235_vm2 = vcmp.lt.s32.totalorder %v1310_v38, 0 }
  0xe1   :  { %v247_v56 = vand.u32 31, %v245_v54  ;;  %v143_v57 = vand.u32 31, %v141_v55  ;;  %v1324_v59 = vshrl.u32 %v245_v54, 5  ;;  %v142_v61 = vshrl.u32 %v141_v55, 5 }
  0xe3   :  { %v248_v60 = vsub.s32 32, %v247_v56  ;;  %v259_v0 = vshll.u32 %v1147_v63, %v247_v56  ;;  %v262_v2 = vshll.u32 %v1148_v1, %v247_v56  ;;  %v144_v3 = vsub.s32 32, %v143_v57 }
  0xe4   :  { %v146_v5 = vshll.u32 %v1149_v4, %v143_v57  ;;  %v149_v11 = vshll.u32 %v1151_v9, %v143_v57  ;;  %v152_v13 = vshll.u32 %v1152_v12, %v143_v57  ;;  %v155_v17 = vshll.u32 %v1147_v63, %v143_v57 }
  0xe5   :  { %v260_v6 = vshrl.u32 %v1148_v1, %v248_v60  ;;  %v263_v8 = vshrl.u32 %v1150_v7, %v248_v60  ;;  %v147_v14 = vshrl.u32 %v1151_v9, %v144_v3  ;;  %v150_v15 = vshrl.u32 %v1152_v12, %v144_v3 }
  0xe6   :  { %v153_v16 = vshrl.u32 %v1147_v63, %v144_v3  ;;  %v145_v18 = vshrl.u32 %v1149_v4, %v144_v3  ;;  %v156_v19 = vshrl.u32 %v1148_v1, %v144_v3  ;;  %v158_v20 = vshll.u32 %v1148_v1, %v143_v57 }
  0xe7   :  { %v159_v21 = vshrl.u32 %v1150_v7, %v144_v3  ;;  %v261_v22 = vor.u32 %v260_v6, %v259_v0  ;;  %v148_v23 = vor.u32 %v147_v14, %v146_v5  ;;  %v151_v24 = vor.u32 %v150_v15, %v149_v11 }
  0xe8   :  { %v154_v25 = vor.u32 %v153_v16, %v152_v13  ;;  %v264_v26 = vor.u32 %v263_v8, %v262_v2  ;;  %v157_v27 = vor.u32 %v156_v19, %v155_v17  ;;  %vm161_vm3 = vcmp.lt.s32.totalorder %v142_v61, 1 }
  0xe9   :  { %v160_v28 = vor.u32 %v159_v21, %v158_v20  ;;  %vm268_vm4 = vcmp.lt.s32.totalorder %v1324_v59, 4  ;;  %vm163_vm5 = vcmp.lt.s32.totalorder %v142_v61, 3  ;;  %vm164_vm6 = vcmp.lt.s32.totalorder %v142_v61, 4 }
  0xea   :  { %v165_v29 = vsel %vm161_vm3, %v145_v18, %v148_v23  ;;  %v166_v30 = vsel %vm164_vm6, %v154_v25, 2102212464  ;;  %v169_v31 = vsel %vm161_vm3, %v148_v23, %v151_v24  ;;  %v170_v32 = vsel %vm164_vm6, %v157_v27, 920167782 }
  0xeb   :  { %v173_v33 = vsel %vm161_vm3, %v151_v24, %v154_v25  ;;  %vm162_vm7 = vcmp.lt.s32.totalorder %v142_v61, 2  ;;  %v167_v34 = vsel %vm163_vm5, %v151_v24, %v166_v30  ;;  %v171_v35 = vsel %vm163_vm5, %v154_v25, %v170_v32 }
  0xec   :  { %v174_v36 = vsel %vm164_vm6, %v160_v28, 1326507024  ;;  %v274_v37 = vsel %vm268_vm4, %v261_v22, 920167782  ;;  %v278_v40 = vsel %vm268_vm4, %v264_v26, 1326507024  ;;  %v172_v41 = vsel %vm162_vm7, %v169_v31, %v171_v35 }
  0xed   :  { %v175_v44 = vsel %vm163_vm5, %v157_v27, %v174_v36  ;;  %v168_v45 = vsel %vm162_vm7, %v165_v29, %v167_v34  ;;  %v1334_v47 = vmul.u32.u64.low %v1322_v58, %v172_v41  ;;  %v1335_v48 = vmul.u32.u64.high %v1322_v58, %v172_v41, %v1334_v47 }
  0xee   :  { %v176_v46 = vsel %vm162_vm7, %v173_v33, %v175_v44  ;;  %v250_v51 = vshll.u32 %v1149_v4, %v247_v56  ;;  %v251_v52 = vshrl.u32 %v1151_v9, %v248_v60  ;;  %v253_v53 = vshll.u32 %v1151_v9, %v247_v56 }
  0xef   :  { %v1338_v49 = vmul.u32.u64.low %v1322_v58, %v176_v46  ;;  %v1339_v50 = vmul.u32.u64.high %v1322_v58, %v176_v46, %v1338_v49  ;;  %v254_v54 = vshrl.u32 %v1152_v12, %v248_v60  ;;  %v256_v55 = vshll.u32 %v1152_v12, %v247_v56 }
  0xf0   :  { %v257_v57 = vshrl.u32 %v1147_v63, %v248_v60  ;;  %v184_v61 = vmul.u32 %v1322_v58, %v168_v45  ;;  %v249_v0 = vshrl.u32 %v1149_v4, %v248_v60  ;;  %v252_v1 = vor.u32 %v251_v52, %v250_v51 }
  0xf1   :  { %vm265_vm8 = vcmp.lt.s32.totalorder %v1324_v59, 1  ;;  %v187_v2 = vadd.s32 1, %v1335_v48  ;;  %v255_v3 = vor.u32 %v254_v54, %v253_v53  ;;  %vm267_vm9 = vcmp.lt.s32.totalorder %v1324_v59, 3 }
  0xf2   :  { %v258_v5 = vor.u32 %v257_v57, %v256_v55  ;;  %vm186_vm10 = vc.u32 %v1339_v50, %v1334_v47  ;;  %vm266_vm11 = vcmp.lt.s32.totalorder %v1324_v59, 2  ;;  %v269_v56 = vsel %vm265_vm8, %v249_v0, %v252_v1 }
  0xf3   :  { %v279_v63 = vsel %vm267_vm9, %v261_v22, %v278_v40  ;;  %v188_v58 = vsel %vm186_vm10, %v187_v2, %v1335_v48  ;;  %v273_v4 = vsel %vm265_vm8, %v252_v1, %v255_v3  ;;  %v185_v35 = vadd.s32 %v1334_v47, %v1339_v50 }
  0xf4   :  { %v270_v60 = vsel %vm268_vm4, %v258_v5, 2102212464  ;;  %v275_v6 = vsel %vm267_vm9, %v258_v5, %v274_v37  ;;  %v189_v7 = vadd.s32 %v188_v58, %v184_v61  ;;  %v277_v11 = vsel %vm265_vm8, %v255_v3, %v258_v5 }
  0xf5   :  { %v271_v8 = vsel %vm267_vm9, %v255_v3, %v270_v60  ;;  %v276_v9 = vsel %vm266_vm11, %v273_v4, %v275_v6  ;;  %v280_v12 = vsel %vm266_vm11, %v277_v11, %v279_v63  ;;  %vm1377_vm3 = vcmp.le.f32.partialorder %v233_v43, 0.7853982 }
  0xf6   :  { %v1357_v13 = vmul.u32.u64.low %v1326_v62, %v276_v9  ;;  %v1358_v14 = vmul.u32.u64.high %v1326_v62, %v276_v9, %v1357_v13  ;;  %v190_v15 = vadd.s32 536870912, %v189_v7  ;;  %v272_v18 = vsel %vm266_vm11, %v269_v56, %v271_v8 }
  0xf7   :  { %v1361_v16 = vmul.u32.u64.low %v1326_v62, %v280_v12  ;;  %v1362_v17 = vmul.u32.u64.high %v1326_v62, %v280_v12, %v1361_v16  ;;  %v288_v22 = vmul.u32 %v1326_v62, %v272_v18  ;;  %vm547_vm7 = vcmask 130048  }
  0xf8   :  { %v191_v19 = vshrl.u32 %v190_v15, 30  ;;  %v291_v20 = vadd.s32 1, %v1358_v14  ;;  %vm221_vm8 = vweird.f32 %v1312_v39 }
  0xf9   :  { %vm290_vm12 = vc.u32 %v1362_v17, %v1357_v13  ;;  %v289_v55 = vadd.s32 %v1357_v13, %v1362_v17 }
  0xfa   :  { %v192_v21 = vshll.u32 %v191_v19, 30  ;;  %v292_v59 = vsel %vm290_vm12, %v291_v20, %v1358_v14  ;;  %v215_v63 = vsub.s32 4, %v191_v19 }
  0xfb   :  { %v293_v24 = vadd.s32 %v292_v59, %v288_v22 }
  0xfc   :  { %v193_v23 = vsub.s32 %v189_v7, %v192_v21  ;;  %v216_v7 = vsel %vm131_vm15, %v215_v63, %v191_v19 }
  0xfd   :  { %v294_v26 = vadd.s32 536870912, %v293_v24  ;;  %v218_v9 = vsel %vm130_vm1, 0, %v216_v7 }
  0xfe   :  { %v195_v25 = vsub.s32 0, %v193_v23  ;;  %v432_v14 = vand.u32 3, %v218_v9  ;;  %v222_v18 = vadd.s32 3, %v218_v9 }
  0xff   :  { %v295_v28 = vshrl.u32 %v294_v26, 30 }
 0x100   :  { %v878_v27 = vmin.u32 %v195_v25, %v193_v23  ;;  %vm437_vm4 = vcmp.eq.s32.totalorder %v432_v14, 2  ;;  %vm434_vm5 = vcmp.eq.s32.totalorder %v432_v14, 0  ;;  %vm433_vm6 = vcmp.lt.s32.totalorder %v432_v14, 2 }
 0x101   :  { %v296_v30 = vshll.u32 %v295_v28, 30  ;;  %v319_v13 = vsub.s32 4, %v295_v28 }
 0x102   :  { %v197_v29 = vclz %v878_v27 }
 0x103   :  { %v297_v32 = vsub.s32 %v293_v24, %v296_v30  ;;  %v320_v20 = vsel %vm235_vm2, %v319_v13, %v295_v28 }
 0x104   :  { %v879_v31 = vadd.s32 4294967294, %v197_v29  ;;  %v322_v59 = vsel %vm1377_vm3, 0, %v320_v20 }
 0x105   :  { %v299_v34 = vsub.s32 0, %v297_v32  ;;  %v535_v26 = vand.u32 3, %v322_v59  ;;  %v326_v27 = vadd.s32 3, %v322_v59 }
 0x106   :  { %vm880_vm13 = vcmp.lt.s32.totalorder %v879_v31, 0 }
 0x107   :  { %v200_v33 = vsel %vm880_vm13, 0, %v879_v31  ;;  %v882_v37 = vmin.u32 %v299_v34, %v297_v32  ;;  %vm540_vm11 = vcmp.eq.s32.totalorder %v535_v26, 2  ;;  %v327_v34 = vand.u32 3, %v326_v27 }
 0x108   :  { %v201_v62 = vsub.s32 32, %v200_v33  ;;  %v205_v36 = vsub.s32 4294967266, %v200_v33  ;;  %v202_v40 = vshll.u32 %v193_v23, %v200_v33  ;;  %v223_v23 = vand.u32 3, %v222_v18 }
 0x109   :  { %v301_v45 = vclz %v882_v37  ;;  %vm537_vm13 = vcmp.eq.s32.totalorder %v535_v26, 0 }
 0x10a   :  { %v203_v41 = vshrl.u32 %v185_v35, %v201_v62  ;;  %v206_v44 = vadd.s32 127, %v205_v36  ;;  %vm225_vm9 = vcmp.eq.s32.totalorder %v223_v23, 0  ;;  %vm228_vm10 = vcmp.eq.s32.totalorder %v223_v23, 2 }
 0x10b   :  { %v883_v49 = vadd.s32 4294967294, %v301_v45  ;;  %vm224_vm12 = vcmp.lt.s32.totalorder %v223_v23, 2 }
 0x10c   :  { %v204_v46 = vor.u32 %v203_v41, %v202_v40  ;;  %v207_v48 = vshll.u32 %v206_v44, 23 }
 0x10d   :  { %vm884_vm14 = vcmp.lt.s32.totalorder %v883_v49, 0 }
 0x10e   :  { %v208_v51 = vor.u32 4788187, %v207_v48  ;;  %v211_v53 = vcvt.s32.f32 %v204_v46  ;;  %v304_v54 = vsel %vm884_vm14, 0, %v883_v49  ;;  %vm536_vm14 = vcmp.lt.s32.totalorder %v535_v26, 2 }
 0x10f   :  { %v305_v57 = vsub.s32 32, %v304_v54  ;;  %v309_v61 = vsub.s32 4294967266, %v304_v54  ;;  %v306_v50 = vshll.u32 %v297_v32, %v304_v54 }
 0x110   :  { %v209_v52 = vand.u32 2147483647, %v208_v51  ;;  %v813_v51 = vpop.permute.xlu1 %812 }
 0x111   :  { %v307_v0 = vshrl.u32 %v289_v55, %v305_v57  ;;  %v310_v1 = vadd.s32 127, %v309_v61  ;;  %826 = vst [vmem:[#allocation11] sm:$0xff] %v813_v51  ;;  %827 = vst [vmem:[#allocation11 + $0x8] sm:$0xff] %v813_v51 }
 0x112   :  { %v212_v47 = vmul.f32 %v211_v53, %v209_v52  ;;  %834 = vst [vmem:[#allocation11 + $0x40] sm:$0xff] %v813_v51  ;;  %835 = vst [vmem:[#allocation11 + $0x48] sm:$0xff] %v813_v51 }
 0x113   :  { %v308_v3 = vor.u32 %v307_v0, %v306_v50  ;;  %v311_v5 = vshll.u32 %v310_v1, 23 }
 0x114   :  { %v213_v2 = vxor.u32 2147483648, %v212_v47 }
 0x115   :  { %v312_v60 = vor.u32 4788187, %v311_v5  ;;  %v315_v6 = vcvt.s32.f32 %v308_v3 }
 0x116   :  { %v214_v56 = vsel %vm131_vm15, %v213_v2, %v212_v47  ;;  %vm325_vm15 = vweird.f32 %v1310_v38 }
 0x117   :  { %v217_v58 = vsel %vm130_vm1, %v1312_v39, %v214_v56  ;;  %v313_v4 = vand.u32 2147483647, %v312_v60  ;;  %vm329_vm1 = vcmp.eq.s32.totalorder %v327_v34, 0  ;;  %v817_v39 = vpop.permute.xlu0 %816 }
 0x118   :  { %989 = vcosq.f32 %v217_v58  ;;  %828 = vst [vmem:[#allocation11 + $0x10] sm:$0xff] %v817_v39  ;;  %829 = vst [vmem:[#allocation11 + $0x18] sm:$0xff] %v817_v39 }
 0x119   :  { %991 = vsinq.f32 %v217_v58  ;;  %v316_v8 = vmul.f32 %v315_v6, %v313_v4  ;;  %836 = vst [vmem:[#allocation11 + $0x50] sm:$0xff] %v817_v39  ;;  %837 = vst [vmem:[#allocation11 + $0x58] sm:$0xff] %v817_v39 }
 0x11b   :  { %v317_v11 = vxor.u32 2147483648, %v316_v8  ;;  %v825_v52 = vpop.permute.xlu0 %824 }
 0x11c   :  { %832 = vst [vmem:[#allocation11 + $0x30] sm:$0xff] %v825_v52  ;;  %833 = vst [vmem:[#allocation11 + $0x38] sm:$0xff] %v825_v52 }
 0x11d   :  { %v318_v42 = vsel %vm235_vm2, %v317_v11, %v316_v8  ;;  %vm332_vm2 = vcmp.eq.s32.totalorder %v327_v34, 2  ;;  %840 = vst [vmem:[#allocation11 + $0x70] sm:$0xff] %v825_v52  ;;  %841 = vst [vmem:[#allocation11 + $0x78] sm:$0xff] %v825_v52 }
 0x11e   :  { %v321_v15 = vsel %vm1377_vm3, %v1310_v38, %v318_v42  ;;  %vm328_vm3 = vcmp.lt.s32.totalorder %v327_v34, 2 }
 0x11f   :  { %993 = vcosq.f32 %v321_v15 }
 0x120   :  { %995 = vsinq.f32 %v321_v15 }
 0x122   :  { %v990_v16 = vpop.eup %989 }
 0x123   :  { %v992_v17 = vpop.eup %991  ;;  %v229_v19 = vxor.u32 2147483648, %v990_v16 }
 0x124   :  { %v226_v21 = vxor.u32 2147483648, %v992_v17 }
 0x125   :  { %v439_v43 = vsel %vm437_vm4, %v229_v19, %v992_v17  ;;  %v230_v31 = vsel %vm228_vm10, %v229_v19, %v992_v17 }
 0x126   :  { %v436_v22 = vsel %vm434_vm5, %v990_v16, %v226_v21  ;;  %v227_v30 = vsel %vm225_vm9, %v990_v16, %v226_v21 }
 0x127   :  { %v440_v24 = vsel %vm433_vm6, %v436_v22, %v439_v43  ;;  %v231_v62 = vsel %vm224_vm12, %v227_v30, %v230_v31 }
 0x128   :  { %v441_v25 = vsel %vm221_vm8, nan, %v440_v24  ;;  %v232_v41 = vsel %vm221_vm8, nan, %v231_v62 }
 0x129   :  { %918 = vmatprep.mubr.msk.f32.mxu0 %vm547_vm7, %v441_v25  ;;  %v994_v28 = vpop.eup %993 }
 0x12a   :  { %v996_v29 = vpop.eup %995  ;;  %v333_v32 = vxor.u32 2147483648, %v994_v28 }
 0x12b   :  { %v330_v33 = vxor.u32 2147483648, %v996_v29 }
 0x12c   :  { %v542_v35 = vsel %vm540_vm11, %v333_v32, %v996_v29  ;;  %v334_v45 = vsel %vm332_vm2, %v333_v32, %v996_v29  ;;  %v938_v38 = vpop.f32.mrb[0].mxu1 }
 0x12d   :  { %v539_v36 = vsel %vm537_vm13, %v994_v28, %v330_v33  ;;  %v331_v44 = vsel %vm329_vm1, %v994_v28, %v330_v33  ;;  %v789_v49 = vpop.f32.mrb[1].mxu1 }
 0x12e   :  { %v543_v37 = vsel %vm536_vm14, %v539_v36, %v542_v35  ;;  %v335_v46 = vsel %vm328_vm3, %v331_v44, %v334_v45 }
 0x12f   :  { %v544_v40 = vsel %vm325_vm15, nan, %v543_v37  ;;  %v336_v48 = vsel %vm325_vm15, nan, %v335_v46 }
 0x130   :  { %919 = vmatmul.mubr.msk.f32.vlgmr.msra.gmra.mrb[0].mxu0 %vm547_vm7, %v544_v40 }
 0x131   :  { %946 = vmatpush3.bf16.msra.mxu0 %v1290_v10  ;;  %925 = vmatprep.mubr.msk.f32.mxu0 %vm547_vm7, %v232_v41  ;;  %v821_v10 = vpop.permute.xlu1 %820 }
 0x132   :  { %830 = vst [vmem:[#allocation11 + $0x20] sm:$0xff] %v821_v10  ;;  %831 = vst [vmem:[#allocation11 + $0x28] sm:$0xff] %v821_v10 }
 0x133   :  { %838 = vst [vmem:[#allocation11 + $0x60] sm:$0xff] %v821_v10  ;;  %839 = vst [vmem:[#allocation11 + $0x68] sm:$0xff] %v821_v10 }
 0x138   :  { %926 = vmatmul.mubr.msk.f32.vlgmr.msra.gmra.mrb[0].mxu0 %vm547_vm7, %v336_v48 }
 0x139   :  { %1096 = shalt.err (!%p1093_p8)
}
 0x13a   :  { %s1097_s13 = scalar_lea.hbm %s1435_s9, 2048 }
 0x13b   :  { %p1098_p9 = scmp.ne.s32.totalorder %s1435_s9, %s1097_s13  ;;  %p1101_p10 = scmp.lt.u32.totalorder %s1097_s13, %s1435_s9 }
 0x13d   :  { %p1103_p11 = pnand %p1101_p10, %p1098_p9 }
 0x13f   :  { %1106 = shalt.err (!%p1103_p11)
}
 0x140   :  { %s1154_s15 = smov 256   ;;  %s1155_s16 = smov 16   ;;  %v801_v54 = vld [vmem:[#allocation8 + $0x8] sm:$0xff]  ;;  %v800_v61 = vld [vmem:[#allocation8] sm:$0xff] }
 0x141   :  { %865 = dma.vmem_to_hbm [thread:$0]  %s860_s7, 2048, %s1435_s9, [#allocation12], %s1154_s15, %s1154_s15, %s1155_s16  }
 0x142   :  { %s1156_s20 = smov [#allocation10]  }
 0x143   :  { %s847_s6 = sshll.u32 %s1156_s20, 4  ;;  %s848_s6 = int_to_ptr.vmem [resolvable:$true] %s847_s6 }
 0x144   :  { %s1107_s17 = scalar_lea.vmem %s848_s6, 256  ;;  %p1112_p13 = scmp.lt.s32.totalorder %s848_s6, %s848_s6 }
 0x145   :  { %p1108_p12 = scmp.ne.s32.totalorder %s848_s6, %s1107_s17  ;;  %p1113_p0 = scmp.lt.s32.totalorder %s1107_s17, %s1107_s17 }
 0x147   :  { %p1114_p1 = por %p1113_p0, %p1112_p13 }
 0x149   :  { %p1115_p2 = pnand %p1114_p1, %p1108_p12 }
 0x20b   :  { %v927_v53 = vpop.f32.mrb[0].mxu0 }
 0x20c   :  { %v955_v55 = vadd.f32 %v938_v38, %v927_v53  ;;  %v701_v57 = vpop.f32.mrb[1].mxu0 }
 0x20d   :  { %v956_v47 = vadd.f32 %v789_v49, %v701_v57 }
 0x20e   :  { %v803_v50 = vadd.f32 %v955_v55, %v801_v54 }
 0x20f   :  { %v802_v0 = vadd.f32 %v956_v47, %v800_v61 }
 0x210   :  { %805 = vst.msk [vmem:[#allocation10 + $0x8] sm:$0xff] %vm716_vm0, %v803_v50 }
 0x211   :  { %804 = vst.msk [vmem:[#allocation10] sm:$0xff] %vm716_vm0, %v802_v0 }
 0x212   :  { %1118 = shalt.err (!%p1115_p2)
}
 0x213   :  { %s1119_s23 = scalar_lea.hbm %s1434_s8, 256 }
 0x214   :  { %p1120_p3 = scmp.ne.s32.totalorder %s1434_s8, %s1119_s23  ;;  %p1123_p4 = scmp.lt.u32.totalorder %s1119_s23, %s1434_s8 }
 0x216   :  { %p1125_p5 = pnand %p1123_p4, %p1120_p3 }
 0x218   :  { %1128 = shalt.err (!%p1125_p5)
}
 0x219   :  { %853 = dma.vmem_to_hbm [thread:$0]  %s848_s6, 256, %s1434_s8, [#allocation4], %s1141_s21, %s1141_s21, %s1142_s22  }
 0x21a   :  { %1135 = dma.done.wait [#allocation4], 256  }
 0x21b   :  { %1136 = vsyncadd [#allocation4], 4294967040 }
 0x21c   :  { %1137 = dma.done.wait [#allocation12], 2048  }
 0x21d   :  { %1138 = vsyncadd [#allocation12], 4294965248 }
 0x21e   :  { %872 = vsyncpa [#allocation3], 1 }
 0x21f   :  { %873 = vsyncpa [#allocation6], 1 }
 0x220   :  { %874 = vsyncpa [#allocation9], 1 }
 0x221   :  { %875 = vsyncpa [#allocation4], 1 }
 0x222   :  { %876 = vsyncpa [#allocation12], 1 }

</bundles_post_ra>
